<compile_context>
chip_gen: v6e
topology: v6e:2x2x1
jax: 0.10.0
libtpu: 0.0.40
codegen_flags: <defaults>
</compile_context>

<pallas_src>
import functools

import jax
import jax.numpy as jnp
from jax.experimental import pallas as pl
from jax.experimental.pallas import tpu as pltpu


def attention_kernel(dec_ref, enc_ref, w1_ref, w2_ref, b_ref, out_ref,
                     m_sc, l_sc, acc_sc, *, approx_recip):
    s_idx = pl.program_id(2)

    @pl.when(s_idx == 0)
    def _init():
        m_sc[...] = jnp.full_like(m_sc, -jnp.inf)
        l_sc[...] = jnp.zeros_like(l_sc)
        acc_sc[...] = jnp.zeros_like(acc_sc)

    dec = dec_ref[0]                          # (tq, Hp), compute dtype
    enc = enc_ref[0]                          # (tk, Hp), compute dtype

    # scores = dec @ enc^T, contracting the last dim of both operands directly
    # (no transpose of enc is materialized).
    scores = jax.lax.dot_general(
        dec, enc,
        dimension_numbers=(((1,), (1,)), ((), ())),
        preferred_element_type=jnp.float32)   # (tq, tk) f32

    # Online (flash-style) softmax update over the streamed encoder axis, in f32.
    m_prev = m_sc[...]
    m_new = jnp.maximum(m_prev, jnp.max(scores, axis=-1, keepdims=True))
    alpha = jnp.exp(m_prev - m_new)
    p = jnp.exp(scores - m_new)
    l_sc[...] = alpha * l_sc[...] + jnp.sum(p, axis=-1, keepdims=True)
    acc_sc[...] = alpha * acc_sc[...] + jnp.dot(
        p.astype(enc.dtype), enc, preferred_element_type=jnp.float32)
    m_sc[...] = m_new

    @pl.when(s_idx == pl.num_programs(2) - 1)
    def _finalize():
        inv_l = pl.reciprocal(l_sc[...], approx=approx_recip)
        attn_val = (acc_sc[...] * inv_l).astype(dec.dtype)       # (tq, Hp)
        # linear_out(concat(attn_val, dec)) == attn_val @ W1 + dec @ W2 + b
        pre = jnp.dot(attn_val, w1_ref[...], preferred_element_type=jnp.float32)
        pre = pre + jnp.dot(dec, w2_ref[...], preferred_element_type=jnp.float32)
        pre = pre + b_ref[...]                                    # (1, Hp) broadcast
        out_ref[0] = jnp.tanh(pre).astype(out_ref.dtype)


def _pick_tile(dim, max_tile):
    """Largest tile <= max_tile that is a multiple of 8 and divides dim; else dim."""
    if dim <= max_tile:
        return dim
    t = (max_tile // 8) * 8
    while t >= 8:
        if dim % t == 0:
            return t
        t -= 8
    return dim  # no clean divisor: fall back to a single full-extent tile


def attention_forward(decoder_output, encoder_output, weight, bias, *,
                      compute_dtype=jnp.bfloat16, tq_max=256, tk_max=512):
    """decoder_output: (B, T, H); encoder_output: (B, S, H);
       weight: (H, 2H) = nn.Linear(2H, H).weight; bias: (H,)."""
    B, T, H = decoder_output.shape
    _, S, _ = encoder_output.shape
    out_dtype = decoder_output.dtype

    # Split W^T (2H, H): rows [0:H] multiply attn_val, rows [H:2H] multiply dec.
    w_t = weight.T
    w1, w2 = w_t[:H], w_t[H:]

    # Pad the hidden dim to a lane-dense multiple of 128 (zero padding is exact).
    Hp = ((H + 127) // 128) * 128
    pad = Hp - H
    if pad:
        decoder_output = jnp.pad(decoder_output, ((0, 0), (0, 0), (0, pad)))
        encoder_output = jnp.pad(encoder_output, ((0, 0), (0, 0), (0, pad)))
        w1 = jnp.pad(w1, ((0, pad), (0, pad)))
        w2 = jnp.pad(w2, ((0, pad), (0, pad)))
        bias = jnp.pad(bias, (0, pad))

    dec = decoder_output.astype(compute_dtype)
    enc = encoder_output.astype(compute_dtype)
    w1 = w1.astype(compute_dtype)
    w2 = w2.astype(compute_dtype)
    bias2d = bias.reshape(1, Hp).astype(jnp.float32)

    tq = _pick_tile(T, tq_max)
    tk = _pick_tile(S, tk_max)
    nt = pl.cdiv(T, tq)
    ns = pl.cdiv(S, tk)

    kernel = functools.partial(
        attention_kernel, approx_recip=(compute_dtype != jnp.float32))

    out = pl.pallas_call(
        kernel,
        out_shape=jax.ShapeDtypeStruct((B, T, Hp), out_dtype),
        grid_spec=pltpu.PrefetchScalarGridSpec(
            num_scalar_prefetch=0,
            grid=(B, nt, ns),
            in_specs=[
                pl.BlockSpec((1, tq, Hp), lambda b, t, s: (b, t, 0)),   # decoder tile
                pl.BlockSpec((1, tk, Hp), lambda b, t, s: (b, s, 0)),   # encoder tile
                pl.BlockSpec((Hp, Hp), lambda b, t, s: (0, 0)),         # W1 (shared)
                pl.BlockSpec((Hp, Hp), lambda b, t, s: (0, 0)),         # W2 (shared)
                pl.BlockSpec((1, Hp), lambda b, t, s: (0, 0)),          # bias (shared)
            ],
            out_specs=pl.BlockSpec((1, tq, Hp), lambda b, t, s: (b, t, 0)),
            scratch_shapes=[
                pltpu.VMEM((tq, 1), jnp.float32),    # running max  m
                pltpu.VMEM((tq, 1), jnp.float32),    # running sum  l
                pltpu.VMEM((tq, Hp), jnp.float32),   # running attn @ enc accumulator
            ],
        ),
        compiler_params=pltpu.CompilerParams(
            dimension_semantics=("parallel", "parallel", "arbitrary"),
            vmem_limit_bytes=64 * 1024 * 1024,
        ),
    )(dec, enc, w1, w2, bias2d)

    return out[:, :, :H] if pad else out


def reference_forward(dec, enc, weight, bias, compute_dtype=jnp.float32):
    dec_c = dec.astype(compute_dtype)
    enc_c = enc.astype(compute_dtype)
    w_c = weight.astype(compute_dtype)
    scores = jnp.einsum("btd,bsd->bts", dec_c, enc_c,
                        preferred_element_type=jnp.float32)
    attn = jax.nn.softmax(scores, axis=-1)
    attn_val = jnp.einsum("bts,bsd->btd", attn.astype(compute_dtype), enc_c,
                          preferred_element_type=jnp.float32)
    combined = jnp.concatenate([attn_val.astype(compute_dtype), dec_c], axis=-1)
    pre = jnp.einsum("btk,hk->bth", combined, w_c,
                     preferred_element_type=jnp.float32) + bias
    return jnp.tanh(pre)


if __name__ == "__main__":
    # (batch, output_len, hidden) / (batch, input_len, hidden)
    B, T, S, H = 2, 8, 8, 32
    key = jax.random.PRNGKey(0)
    k1, k2, k3, k4 = jax.random.split(key, 4)

    decoder_output = jax.random.normal(k1, (B, T, H), dtype=jnp.float32)
    encoder_output = jax.random.normal(k2, (B, S, H), dtype=jnp.float32)

    # nn.Linear(dim*2, dim): weight (H, 2H), bias (H,)
    bound = 1.0 / jnp.sqrt(2.0 * H)
    weight = jax.random.uniform(k3, (H, 2 * H), minval=-bound, maxval=bound,
                                dtype=jnp.float32)
    bias = jax.random.uniform(k4, (H,), minval=-bound, maxval=bound,
                              dtype=jnp.float32)

    # Exact path: f32 MXU operands + exact reciprocal -> tight check.
    out_f32 = attention_forward(decoder_output, encoder_output, weight, bias,
                                compute_dtype=jnp.float32)
    out_f32 = jax.block_until_ready(out_f32)
    ref_f32 = reference_forward(decoder_output, encoder_output, weight, bias)
    assert out_f32.shape == (B, T, H)
    assert jnp.allclose(out_f32, ref_f32, atol=2e-5, rtol=2e-5), \
        f"f32 max diff {jnp.max(jnp.abs(out_f32 - ref_f32))}"

    # Fast path: bf16 MXU operands (f32 accumulation) + approx reciprocal,
    # checked against a matched bf16-operand reference.
    out_bf16 = attention_forward(decoder_output, encoder_output, weight, bias,
                                 compute_dtype=jnp.bfloat16)
    out_bf16 = jax.block_until_ready(out_bf16)
    ref_bf16 = reference_forward(decoder_output, encoder_output, weight, bias,
                                 compute_dtype=jnp.bfloat16)
    assert out_bf16.shape == (B, T, H)
    assert jnp.allclose(out_bf16, ref_bf16, atol=2e-2, rtol=2e-2), \
        f"bf16 max diff {jnp.max(jnp.abs(out_bf16 - ref_bf16))}"

    print("KERNEL_OK")
</pallas_src>

<mosaic_0001>
module attributes {stable_mosaic.version = 11 : i64} {
  func.func @attention_kernel(%arg0: i32, %arg1: i32, %arg2: i32, %arg3: memref<1x8x128xf32, #tpu.memory_space<vmem>>, %arg4: memref<1x8x128xf32, #tpu.memory_space<vmem>>, %arg5: memref<128x128xf32, #tpu.memory_space<vmem>>, %arg6: memref<128x128xf32, #tpu.memory_space<vmem>>, %arg7: memref<1x128xf32, #tpu.memory_space<vmem>>, %arg8: memref<1x8x128xf32, #tpu.memory_space<vmem>>, %arg9: memref<8x1xf32, #tpu.memory_space<vmem>>, %arg10: memref<8x1xf32, #tpu.memory_space<vmem>>, %arg11: memref<8x128xf32, #tpu.memory_space<vmem>>) attributes {dimension_semantics = [#tpu.dimension_semantics<parallel>, #tpu.dimension_semantics<parallel>, #tpu.dimension_semantics<arbitrary>], iteration_bounds = array<i64: 2, 1, 1>, scalar_prefetch = 0 : i64, scratch_operands = 3 : i64, tpu.core_type = #tpu.core_type<tc>, window_params = [{transform_indices = @transform_0, window_bounds = array<i64: 1, 8, 128>}, {transform_indices = @transform_1, window_bounds = array<i64: 1, 8, 128>}, {pipeline_mode = #tpu.pipeline_mode<synchronous>, transform_indices = @transform_2, window_bounds = array<i64: 128, 128>}, {pipeline_mode = #tpu.pipeline_mode<synchronous>, transform_indices = @transform_3, window_bounds = array<i64: 128, 128>}, {pipeline_mode = #tpu.pipeline_mode<synchronous>, transform_indices = @transform_4, window_bounds = array<i64: 1, 128>}, {transform_indices = @transform_5, window_bounds = array<i64: 1, 8, 128>}]} {
    %c0_i32 = arith.constant 0 : i32
    %0 = arith.cmpi eq, %arg2, %c0_i32 : i32
    %1 = arith.extui %0 : i1 to i32
    %c0_i32_0 = arith.constant 0 : i32
    %2 = arith.cmpi ne, %1, %c0_i32_0 : i32
    scf.if %2 {
      %cst_23 = arith.constant 0xFF800000 : f32
      %33 = vector.broadcast %cst_23 : f32 to vector<8x1xf32>
      %c0_24 = arith.constant 0 : index
      %c0_25 = arith.constant 0 : index
      %34 = vector.load %arg9[%c0_24, %c0_25] : memref<8x1xf32, #tpu.memory_space<vmem>>, vector<8x1xf32>
      tpu.vector_store %arg9[%c0_24, %c0_25], %33 {strides = array<i32>} : memref<8x1xf32, #tpu.memory_space<vmem>>, vector<8x1xf32>,
      %cst_26 = arith.constant 0.000000e+00 : f32
      %35 = vector.broadcast %cst_26 : f32 to vector<8x1xf32>
      %c0_27 = arith.constant 0 : index
      %c0_28 = arith.constant 0 : index
      %36 = vector.load %arg10[%c0_27, %c0_28] : memref<8x1xf32, #tpu.memory_space<vmem>>, vector<8x1xf32>
      tpu.vector_store %arg10[%c0_27, %c0_28], %35 {strides = array<i32>} : memref<8x1xf32, #tpu.memory_space<vmem>>, vector<8x1xf32>,
      %cst_29 = arith.constant 0.000000e+00 : f32
      %37 = vector.broadcast %cst_29 : f32 to vector<8x128xf32>
      %c0_30 = arith.constant 0 : index
      %c0_31 = arith.constant 0 : index
      %38 = vector.load %arg11[%c0_30, %c0_31] : memref<8x128xf32, #tpu.memory_space<vmem>>, vector<8x128xf32>
      tpu.vector_store %arg11[%c0_30, %c0_31], %37 {strides = array<i32>} : memref<8x128xf32, #tpu.memory_space<vmem>>, vector<8x128xf32>,
    } else {
    }
    %c0 = arith.constant 0 : index
    %c0_1 = arith.constant 0 : index
    %c0_2 = arith.constant 0 : index
    %3 = vector.load %arg3[%c0, %c0_1, %c0_2] : memref<1x8x128xf32, #tpu.memory_space<vmem>>, vector<1x8x128xf32>
    %4 = vector.shape_cast %3 : vector<1x8x128xf32> to vector<8x128xf32>
    %c0_3 = arith.constant 0 : index
    %c0_4 = arith.constant 0 : index
    %c0_5 = arith.constant 0 : index
    %5 = vector.load %arg4[%c0_3, %c0_4, %c0_5] : memref<1x8x128xf32, #tpu.memory_space<vmem>>, vector<1x8x128xf32>
    %6 = vector.shape_cast %5 : vector<1x8x128xf32> to vector<8x128xf32>
    %cst = arith.constant dense<0.000000e+00> : vector<8x8xf32>
    %7 = tpu.matmul %4, %6, %cst {dimension_numbers = #tpu.dot_dimension_numbers<[1], [1], [0], [0], [0, 0, 1, 0], [], []>} : vector<8x128xf32>, vector<8x128xf32>, vector<8x8xf32> -> vector<8x8xf32>
    %c0_6 = arith.constant 0 : index
    %c0_7 = arith.constant 0 : index
    %8 = vector.load %arg9[%c0_6, %c0_7] : memref<8x1xf32, #tpu.memory_space<vmem>>, vector<8x1xf32>
    %cst_8 = arith.constant dense<0xFF800000> : vector<8xf32>
    %9 = vector.multi_reduction <maximumf>, %7, %cst_8 [1] : vector<8x8xf32> to vector<8xf32>
    %10 = vector.shape_cast %9 : vector<8xf32> to vector<8x1xf32>
    %11 = arith.maximumf %8, %10 : vector<8x1xf32>
    %12 = arith.subf %8, %11 : vector<8x1xf32>
    %13 = math.exp %12 : vector<8x1xf32>
    %14 = vector.broadcast %11 : vector<8x1xf32> to vector<8x8xf32>
    %15 = arith.subf %7, %14 : vector<8x8xf32>
    %16 = math.exp %15 : vector<8x8xf32>
    %c0_9 = arith.constant 0 : index
    %c0_10 = arith.constant 0 : index
    %17 = vector.load %arg10[%c0_9, %c0_10] : memref<8x1xf32, #tpu.memory_space<vmem>>, vector<8x1xf32>
    %18 = arith.mulf %13, %17 : vector<8x1xf32>
    %cst_11 = arith.constant dense<0.000000e+00> : vector<8xf32>
    %19 = vector.multi_reduction <add>, %16, %cst_11 [1] : vector<8x8xf32> to vector<8xf32>
    %20 = vector.shape_cast %19 : vector<8xf32> to vector<8x1xf32>
    %21 = arith.addf %18, %20 : vector<8x1xf32>
    %c0_12 = arith.constant 0 : index
    %c0_13 = arith.constant 0 : index
    %22 = vector.load %arg10[%c0_12, %c0_13] : memref<8x1xf32, #tpu.memory_space<vmem>>, vector<8x1xf32>
    tpu.vector_store %arg10[%c0_12, %c0_13], %21 {strides = array<i32>} : memref<8x1xf32, #tpu.memory_space<vmem>>, vector<8x1xf32>,
    %c0_14 = arith.constant 0 : index
    %c0_15 = arith.constant 0 : index
    %23 = vector.load %arg11[%c0_14, %c0_15] : memref<8x128xf32, #tpu.memory_space<vmem>>, vector<8x128xf32>
    %24 = vector.broadcast %13 : vector<8x1xf32> to vector<8x128xf32>
    %25 = arith.mulf %24, %23 : vector<8x128xf32>
    %cst_16 = arith.constant dense<0.000000e+00> : vector<8x128xf32>
    %26 = tpu.matmul %16, %6, %cst_16 {dimension_numbers = #tpu.dot_dimension_numbers<[1], [0], [0], [1], [0, 0, 1, 1], [], []>} : vector<8x8xf32>, vector<8x128xf32>, vector<8x128xf32> -> vector<8x128xf32>
    %27 = arith.addf %25, %26 : vector<8x128xf32>
    %c0_17 = arith.constant 0 : index
    %c0_18 = arith.constant 0 : index
    %28 = vector.load %arg11[%c0_17, %c0_18] : memref<8x128xf32, #tpu.memory_space<vmem>>, vector<8x128xf32>
    tpu.vector_store %arg11[%c0_17, %c0_18], %27 {strides = array<i32>} : memref<8x128xf32, #tpu.memory_space<vmem>>, vector<8x128xf32>,
    %c0_19 = arith.constant 0 : index
    %c0_20 = arith.constant 0 : index
    %29 = vector.load %arg9[%c0_19, %c0_20] : memref<8x1xf32, #tpu.memory_space<vmem>>, vector<8x1xf32>
    tpu.vector_store %arg9[%c0_19, %c0_20], %11 {strides = array<i32>} : memref<8x1xf32, #tpu.memory_space<vmem>>, vector<8x1xf32>,
    %c0_i32_21 = arith.constant 0 : i32
    %30 = arith.cmpi eq, %arg2, %c0_i32_21 : i32
    %31 = arith.extui %30 : i1 to i32
    %c0_i32_22 = arith.constant 0 : i32
    %32 = arith.cmpi ne, %31, %c0_i32_22 : i32
    scf.if %32 {
      %c0_23 = arith.constant 0 : index
      %c0_24 = arith.constant 0 : index
      %33 = vector.load %arg10[%c0_23, %c0_24] : memref<8x1xf32, #tpu.memory_space<vmem>>, vector<8x1xf32>
      %34 = tpu.reciprocal %33 : vector<8x1xf32> -> vector<8x1xf32>
      %c0_25 = arith.constant 0 : index
      %c0_26 = arith.constant 0 : index
      %35 = vector.load %arg11[%c0_25, %c0_26] : memref<8x128xf32, #tpu.memory_space<vmem>>, vector<8x128xf32>
      %36 = vector.broadcast %34 : vector<8x1xf32> to vector<8x128xf32>
      %37 = arith.mulf %35, %36 : vector<8x128xf32>
      %c0_27 = arith.constant 0 : index
      %c0_28 = arith.constant 0 : index
      %38 = vector.load %arg5[%c0_27, %c0_28] : memref<128x128xf32, #tpu.memory_space<vmem>>, vector<128x128xf32>
      %cst_29 = arith.constant dense<0.000000e+00> : vector<8x128xf32>
      %39 = tpu.matmul %37, %38, %cst_29 {dimension_numbers = #tpu.dot_dimension_numbers<[1], [0], [0], [1], [0, 0, 1, 1], [], []>} : vector<8x128xf32>, vector<128x128xf32>, vector<8x128xf32> -> vector<8x128xf32>
      %c0_30 = arith.constant 0 : index
      %c0_31 = arith.constant 0 : index
      %40 = vector.load %arg6[%c0_30, %c0_31] : memref<128x128xf32, #tpu.memory_space<vmem>>, vector<128x128xf32>
      %cst_32 = arith.constant dense<0.000000e+00> : vector<8x128xf32>
      %41 = tpu.matmul %4, %40, %cst_32 {dimension_numbers = #tpu.dot_dimension_numbers<[1], [0], [0], [1], [0, 0, 1, 1], [], []>} : vector<8x128xf32>, vector<128x128xf32>, vector<8x128xf32> -> vector<8x128xf32>
      %42 = arith.addf %39, %41 : vector<8x128xf32>
      %c0_33 = arith.constant 0 : index
      %c0_34 = arith.constant 0 : index
      %43 = vector.load %arg7[%c0_33, %c0_34] : memref<1x128xf32, #tpu.memory_space<vmem>>, vector<1x128xf32>
      %44 = vector.broadcast %43 : vector<1x128xf32> to vector<8x128xf32>
      %45 = arith.addf %42, %44 : vector<8x128xf32>
      %46 = math.tanh %45 : vector<8x128xf32>
      %c0_35 = arith.constant 0 : index
      %c0_36 = arith.constant 0 : index
      %c0_37 = arith.constant 0 : index
      %47 = vector.load %arg8[%c0_35, %c0_36, %c0_37] : memref<1x8x128xf32, #tpu.memory_space<vmem>>, vector<1x8x128xf32>
      %48 = vector.shape_cast %47 : vector<1x8x128xf32> to vector<8x128xf32>
      %49 = vector.shape_cast %46 : vector<8x128xf32> to vector<1x8x128xf32>
      tpu.vector_store %arg8[%c0_35, %c0_36, %c0_37], %49 {strides = array<i32>} : memref<1x8x128xf32, #tpu.memory_space<vmem>>, vector<1x8x128xf32>,
    } else {
    }
    return
  }
  func.func @transform_0(%arg0: i32, %arg1: i32, %arg2: i32) -> (i32, i32, i32) {
    %c0_i32 = arith.constant 0 : i32
    %c0_i32_0 = arith.constant 0 : i32
    return %arg0, %arg1, %c0_i32 : i32, i32, i32
  }
  func.func @transform_1(%arg0: i32, %arg1: i32, %arg2: i32) -> (i32, i32, i32) {
    %c0_i32 = arith.constant 0 : i32
    %c0_i32_0 = arith.constant 0 : i32
    return %arg0, %arg2, %c0_i32 : i32, i32, i32
  }
  func.func @transform_2(%arg0: i32, %arg1: i32, %arg2: i32) -> (i32, i32) {
    %c0_i32 = arith.constant 0 : i32
    %c0_i32_0 = arith.constant 0 : i32
    %c0_i32_1 = arith.constant 0 : i32
    return %c0_i32, %c0_i32_0 : i32, i32
  }
  func.func @transform_3(%arg0: i32, %arg1: i32, %arg2: i32) -> (i32, i32) {
    %c0_i32 = arith.constant 0 : i32
    %c0_i32_0 = arith.constant 0 : i32
    %c0_i32_1 = arith.constant 0 : i32
    return %c0_i32, %c0_i32_0 : i32, i32
  }
  func.func @transform_4(%arg0: i32, %arg1: i32, %arg2: i32) -> (i32, i32) {
    %c0_i32 = arith.constant 0 : i32
    %c0_i32_0 = arith.constant 0 : i32
    %c0_i32_1 = arith.constant 0 : i32
    return %c0_i32, %c0_i32_0 : i32, i32
  }
  func.func @transform_5(%arg0: i32, %arg1: i32, %arg2: i32) -> (i32, i32, i32) {
    %c0_i32 = arith.constant 0 : i32
    %c0_i32_0 = arith.constant 0 : i32
    return %arg0, %arg1, %c0_i32 : i32, i32, i32
  }
}

</mosaic_0001>

<bundles_post_ra>
// kernel: tpu_custom_call.1
= control target key start
LH: loop header
LB: loop body
LE: loop exit
PB: predicated region body
PF: predicated region fallthrough
CT: control target
= control target key end

     0   :  { %s1609_s0 = inlined_call_operand.hbm [shape: f32[2,8,128], index: 0, kind: input, shape index: {}]   ;;  %s1610_s1 = inlined_call_operand.hbm [shape: f32[2,8,128], index: 1, kind: input, shape index: {}]   ;;  %s1611_s2 = inlined_call_operand.hbm [shape: f32[128,128], index: 2, kind: input, shape index: {}]   ;;  %s1612_s3 = inlined_call_operand.hbm [shape: f32[128,128], index: 3, kind: input, shape index: {}]   ;;  %s1613_s4 = inlined_call_operand.vmem [shape: f32[1,128], index: 4, kind: input, shape index: {}]   ;;  %s1614_s5 = inlined_call_operand.hbm [shape: f32[2,8,128], index: 5, kind: output, shape index: {}]  }
   0x1   :  { %1616 = sst [smem:[#allocation19_spill]] %s1609_s0 }
   0x2   :  { %1617 = sst [smem:[#allocation20_spill]] %s1610_s1 }
   0x3   :  { %1618 = sst [smem:[#allocation21_spill]] %s1611_s2 }
   0x4   :  { %10 = vsyncpa [#allocation6], 0 }
   0x5   :  { %12 = vsyncpa [#allocation6 + $0x1], 0 }
   0x6   :  { %13 = vsyncpa [#allocation9], 0 }
   0x7   :  { %15 = vsyncpa [#allocation9 + $0x1], 0 }
   0x8   :  { %16 = vsyncpa [#allocation12], 0 }
   0x9   :  { %17 = vsyncpa [#allocation7], 0 }
   0xa   :  { %19 = vsyncpa [#allocation7 + $0x1], 0  ;;  %s1343_s18 = smov 0   ;;  %s1345_s19 = smov 0  }
   0xb   :  { %s1347_s20 = smov 0   ;;  %s1349_s21 = smov 0  }
   0xc   :  { %s1351_s22 = smov 0   ;;  %s1353_s23 = smov 0  }
   0xd LB: > { %s1374_s24 = sadd.s32 4294967295, %s1300_s23   ;;  %s857_s25 = sadd.s32 4294967294, %s1300_s23   ;;  %s1300_s23 = sphi %s1353_s23, %s25_s23   ;;  %s1296_s22 = sphi %s1351_s22, %s1639_s22   ;;  %s1292_s21 = sphi %s1349_s21, %s1638_s21   ;;  %s1288_s20 = sphi %s1347_s20, %s1637_s20   ;;  %s1284_s19 = sphi %s1345_s19, %s1636_s19   ;;  %s1280_s18 = sphi %s1343_s18, %s1635_s18  }
   0xe   : > { %p66_p0 = scmp.ne.s32.totalorder %s1284_s19, %s1280_s18  ;;  %p1615_p1 = scmp.eq.s32.totalorder %s1374_s24, 0 }
   0xf   : > { %p189_p3 = scmp.eq.s32.totalorder %s857_s25, 1  ;;  %p858_p5 = scmp.ge.s32.totalorder %s1300_s23, 1 }
  0x10   : > { %p1383_p4 = por %p1615_p1, %p66_p0  ;;  %p196_p7 = scmp.lt.s32.totalorder %s1300_s23, 3 }
  0x11   : > { %p1388_p6 = por %p189_p3, %p66_p0  ;;  %s1302_s29 = smov [#allocation10]  }
  0x12   : > { %p1393_p8 = pnand %p858_p5, %p196_p7  ;;  %s208_s30 = sshll.u32 %s1302_s29, 4  ;;  %s209_s30 = int_to_ptr.vmem [resolvable:$true] %s208_s30 }
  0x13   : > { %s1620_s27 = scalar_select %p1388_p6, 1, 0 }
  0x14   : > { %p1010_p9 = pneg %p1393_p8  ;;  %s1303_s7 = smov [#allocation11]  }
  0x15   : > { %s221_s8 = sshll.u32 %s1303_s7, 4  ;;  %s1111_s9 = scalar_lea.vmem %s209_s30, 2048  ;;  %s222_s8 = int_to_ptr.vmem [resolvable:$true] %s221_s8 }
  0x16   : > { %p1402_p11 = pnand %p1010_p9, %p1615_p1  ;;  %p1112_p13 = scmp.ne.s32.totalorder %s209_s30, %s1111_s9 }
  0x17   : > { %p1119_p5 = scmp.lt.s32.totalorder %s209_s30, %s209_s30  ;;  %p1120_p7 = scmp.lt.s32.totalorder %s1111_s9, %s1111_s9 }
  0x18   : > { %p1102_p12 = pneg %p1402_p11 }
  0x19   : > { %p1121_p10 = por %p1120_p7, %p1119_p5 }
  0x1a   : > { %p1114_p0 = pnand %p1112_p13, %p1102_p12 }
  0x1c   : > { %p1115_p3 = pneg %p1114_p0 }
  0x1e   : > { %p1122_p9 = pnand %p1121_p10, %p1115_p3 }
  0x20   : > { %1125 = shalt.err (!%p1122_p9)
}
  0x21   : > { %s1304_s10 = smov 128   ;;  %s1305_s11 = smov 8  }
  0x22   : > { %s1623_s2 = sld [smem:[#allocation21_spill]]  ;;  %s1137_s14 = scalar_lea.vmem %s222_s8, 2048 }
  0x23   : > { %p1138_p1 = scmp.ne.s32.totalorder %s222_s8, %s1137_s14  ;;  %p1145_p2 = scmp.lt.s32.totalorder %s222_s8, %s222_s8 }
  0x24   : > { %p1146_p6 = scmp.lt.s32.totalorder %s1137_s14, %s1137_s14 }
  0x25   : > { %p1140_p13 = pnand %p1138_p1, %p1102_p12 }
  0x26   : > { %p1147_p5 = por %p1146_p6, %p1145_p2 }
  0x27   : > { %p1141_p0 = pneg %p1140_p13 }
  0x28   : > { %1013 = dma.hbm_to_vmem [thread:$0]  (!%p1402_p11), %s1623_s2, 2048, %s209_s30, [#allocation9], %s1304_s10, %s1304_s10, %s1305_s11  }
  0x29   : > { %p1148_p10 = pnand %p1147_p5, %p1141_p0 }
  0x2b   : > { %1151 = shalt.err (!%p1148_p10)
}
  0x2c   : > { %1016 = dma.hbm_to_vmem [thread:$0]  (!%p1402_p11), %s1612_s3, 2048, %s222_s8, [#allocation12], %s1304_s10, %s1304_s10, %s1305_s11  }
  0x2d   : > { %s44_s17 = sadd.s32 1, %s1296_s22  ;;  %s53_s25 = sadd.s32 1, %s1288_s20 }
  0x2e   : > { %p46_p1 = scmp.ge.s32.totalorder %s44_s17, 2  ;;  %p60_p2 = scmp.ne.s32.totalorder %s1288_s20, %s1284_s19 }
  0x2f   : > { %p61_p6 = scmp.eq.s32.totalorder %s1300_s23, 0  ;;  %p1030_p12 = scmp.lt.s32.totalorder %s1300_s23, 2 }
  0x30   : > { %s1641_s17 = smov (%p46_p1, %s44_s17), 0  ;;  %p1624_p7 = scmp.eq.s32.totalorder %s1374_s24, 1 }
  0x31   : > { %p62_p3 = por %p61_p6, %p60_p2  ;;  %s48_s30 = ssub.s32 %s1296_s22, %s1641_s17 }
  0x32   : > { %p1434_p9 = por %p1624_p7, %p60_p2  ;;  %s238_s6 = sand.u32 1, %s1288_s20  }
  0x33   : > { %p51_p13 = scmp.eq.s32.totalorder %s48_s30, 0  ;;  %s862_s7 = sshll.u32 %s238_s6, 3 }
  0x34   : > { %s863_s8 = sshll.u32 %s1296_s22, 7  ;;  %s1626_s0 = sld [smem:[#allocation19_spill]] }
  0x35   : > { %s1443_s9 = scalar_select %p51_p13, %s1288_s20, %s53_s25  }
  0x36   : > { %s242_s13 = scalar_lea.vmem [#allocation5], %s862_s7  ;;  %p1450_p11 = pnand %p1030_p12, %p62_p3 }
  0x37   : > { %s250_s14 = sshll.u32 %s242_s13, 4  ;;  %s1628_s1 = sld [smem:[#allocation20_spill]]  ;;  %s251_s14 = int_to_ptr.vmem [resolvable:$true] %s250_s14 }
  0x38   : > { %s239_s25 = scalar_lea.sflag [#allocation6], %s238_s6  ;;  %p1154_p0 = pneg %p1450_p11 }
  0x39   : > { %s1165_s10 = scalar_lea.vmem %s251_s14, 128  ;;  %s1306_s11 = smov [#allocation5]  }
  0x3a   : > { %s248_s12 = scalar_lea.hbm %s1626_s0, %s863_s8  ;;  %p1166_p5 = scmp.ne.s32.totalorder %s251_s14, %s1165_s10 }
  0x3b   : > { %s1170_s13 = sshll.u32 %s1306_s11, 4  ;;  %s1171_s13 = int_to_ptr.vmem [resolvable:$false] %s1170_s13 }
  0x3c   : > { %p1168_p10 = pnand %p1166_p5, %p1154_p0  ;;  %s1172_s0 = scalar_lea.vmem %s1171_s13, 256 }
  0x3d   : > { %s1457_s2 = scalar_lea.hbm %s1628_s1, %s863_s8  ;;  %p1173_p2 = scmp.lt.s32.totalorder %s251_s14, %s1171_s13 }
  0x3e   : > { %p1169_p1 = pneg %p1168_p10  ;;  %p1174_p6 = scmp.lt.s32.totalorder %s1172_s0, %s1165_s10 }
  0x40   : > { %p1175_p12 = por %p1174_p6, %p1173_p2 }
  0x42   : > { %p1176_p3 = pnand %p1175_p12, %p1169_p1 }
  0x44   : > { %1179 = shalt.err (!%p1176_p3)
}
  0x45   : > { %1020 = dma.hbm_to_vmem [thread:$0]  (!%p1450_p11), %s248_s12, 128, %s251_s14, %s239_s25  }
  0x46   : > { %s257_s6 = sand.u32 1, %s1300_s23   ;;  %s261_s8 = scalar_lea.vmem [#allocation8], %s862_s7 }
  0x47   : > { %s269_s16 = sshll.u32 %s261_s8, 4  ;;  %s258_s30 = scalar_lea.sflag [#allocation9], %s257_s6  ;;  %s270_s16 = int_to_ptr.vmem [resolvable:$true] %s269_s16 }
  0x48   : > { %s1193_s1 = scalar_lea.vmem %s270_s16, 128  ;;  %s1307_s0 = smov [#allocation8]  }
  0x49   : > { %p1194_p7 = scmp.ne.s32.totalorder %s270_s16, %s1193_s1  ;;  %s1198_s10 = sshll.u32 %s1307_s0, 4  ;;  %s1199_s10 = int_to_ptr.vmem [resolvable:$false] %s1198_s10 }
  0x4a   : > { %s1200_s11 = scalar_lea.vmem %s1199_s10, 256  ;;  %p1201_p10 = scmp.lt.s32.totalorder %s270_s16, %s1199_s10 }
  0x4b   : > { %p1196_p13 = pnand %p1194_p7, %p1154_p0  ;;  %p1202_p1 = scmp.lt.s32.totalorder %s1200_s11, %s1193_s1 }
  0x4d   : > { %p1197_p5 = pneg %p1196_p13  ;;  %p1203_p2 = por %p1202_p1, %p1201_p10 }
  0x4f   : > { %p1204_p6 = pnand %p1203_p2, %p1197_p5 }
  0x51   : > { %1207 = shalt.err (!%p1204_p6)
}
  0x52   : > { %1023 = dma.hbm_to_vmem [thread:$0]  (!%p1450_p11), %s1457_s2, 128, %s270_s16, %s258_s30  }
  0x53   : > { %278 = sbr.rel (%p1393_p8) target bundleno = 1093 (0x445), region = 40  ;;  %s1476_s7 = sand.u32 (!%p1393_p8), 1, %s1284_s19  }
  0x54   : > { %s1479_s12 = sshll.u32 (!%p1393_p8), %s1476_s7, 3  ;;  %s281_s1 = scalar_lea.sflag (!%p1393_p8), [#allocation6], %s1476_s7 }
  0x55   : > { %s284_s14 = scalar_lea.vmem (!%p1393_p8), [#allocation5], %s1479_s12 }
  0x58   : > { %1259 = dma.done.wait (%p1383_p4), %s281_s1, 128  }
  0x59   : > { %1261 = vsyncadd (%p1383_p4), %s281_s1, 4294967168  ;;  %s289_s2 = sand.u32 1, %s1374_s24   ;;  %s293_s15 = scalar_lea.vmem [#allocation8], %s1479_s12 }
  0x5a   : > { %s290_s28 = scalar_lea.sflag [#allocation9], %s289_s2 }
  0x5b   : > { %1263 = dma.done.wait (%p1383_p4), %s290_s28, 128  }
  0x5c   : > { %1265 = vsyncadd (%p1383_p4), %s290_s28, 4294967168  ;;  %p1629_p8 = scmp.eq.s32.totalorder %s1374_s24, 0 }
  0x5e   : > { %1267 = dma.done.wait (%p1629_p8), [#allocation9], 2048   ;;  %p1630_p11 = pmov %p1629_p8 }
  0x5f   : > { %p1631_p0 = pmov %p1629_p8 }
  0x60   : > { %1269 = vsyncadd (%p1630_p11), [#allocation9], 4294965248 }
  0x61   : > { %1271 = dma.done.wait (%p1631_p0), [#allocation12], 2048   ;;  %p1632_p12 = pmov %p1631_p0 }
  0x62   : > { %v1308_v0 = vmov 0.0   ;;  %vm1309_vm0 = vmmov 0   ;;  %v342_v1 = vld [vmem:[%s293_s15] sm:$0xff]  ;;  %v1507_v2 = vld [vmem:[%s284_s14] sm:$0xff]  ;;  %vm337_vm1 = vcmask 7168   ;;  %v1310_v3 = vmov -inf  }
  0x63   : > { %1273 = vsyncadd (%p1632_p12), [#allocation12], 4294965248  ;;  %916 = vmatprep.subr.mxu0 %v1308_v0  ;;  %918 = vmatprep.mubr.msk.f32.mxu0 %vm1309_vm0, %v1308_v0  ;;  %338 = vst.msk [vmem:[#allocation2] sm:$0xff] %vm337_vm1, %v1310_v3  ;;  %vm414_vm2 = vcmask 64512   ;;  %v1311_v7 = vmov 0   ;;  %v564_v19 = vld [vmem:[#allocation11 + $0x78] sm:$0xff] }
  0x64   : > { %921 = vmatprep.subr.mxu1 %v1308_v0  ;;  %923 = vmatprep.mubr.msk.f32.mxu1 %vm1309_vm0, %v1308_v0  ;;  %339 = vst.msk [vmem:[#allocation3] sm:$0xff] %vm337_vm1, %v1308_v0  ;;  %v563_v20 = vld [vmem:[#allocation11 + $0x70] sm:$0xff]  ;;  %v548_v21 = vld [vmem:[#allocation10 + $0x78] sm:$0xff]  ;;  %v562_v23 = vld [vmem:[#allocation11 + $0x68] sm:$0xff]  ;;  %s875_s25 = sshll.u32 %s1292_s21, 7  ;;  %s332_s13 = scalar_lea.vmem [#allocation13], %s1479_s12 }
  0x65   : > { %917 = vmatpush3.xpose.msra.mxu0 %v342_v1  ;;  %922 = vmatpush3.msra.mxu1 %v342_v1  ;;  %v547_v22 = vld [vmem:[#allocation10 + $0x70] sm:$0xff]  ;;  %v546_v24 = vld [vmem:[#allocation10 + $0x68] sm:$0xff]  ;;  %v561_v25 = vld [vmem:[#allocation11 + $0x60] sm:$0xff]  ;;  %s730_s6 = sshll.u32 %s332_s13, 4  ;;  %s1567_s30 = scalar_lea.hbm %s1614_s5, %s875_s25  ;;  %s731_s6 = int_to_ptr.vmem [resolvable:$true] %s730_s6 }
  0x66   : > { %926 = vmatprep.subr.mxu1 %v1308_v0  ;;  %961 = vmatprep.subr.mxu0 %v1308_v0  ;;  %v545_v26 = vld [vmem:[#allocation10 + $0x60] sm:$0xff]  ;;  %v560_v27 = vld [vmem:[#allocation11 + $0x58] sm:$0xff]  ;;  %v559_v29 = vld [vmem:[#allocation11 + $0x50] sm:$0xff]  ;;  %s716_s0 = scalar_lea.sflag [#allocation7], %s1476_s7  ;;  %s1208_s10 = scalar_lea.vmem %s731_s6, 128 }
  0x67   : > { %1090 = vset.pattern.permute.xlu0 %v1311_v7  ;;  %1091 = vset.pattern.permute.xlu1 %v1311_v7  ;;  %v544_v28 = vld [vmem:[#allocation10 + $0x58] sm:$0xff]  ;;  %v543_v30 = vld [vmem:[#allocation10 + $0x50] sm:$0xff]  ;;  %v558_v31 = vld [vmem:[#allocation11 + $0x48] sm:$0xff]  ;;  %p1209_p4 = scmp.ne.s32.totalorder %s731_s6, %s1208_s10  ;;  %s1312_s11 = smov [#allocation13]  }
  0x68   : > { %919 = vmatmul.mubr.f32.vlgmr.msra.gmra.mxu0 %v1507_v2  ;;  %v542_v32 = vld [vmem:[#allocation10 + $0x48] sm:$0xff]  ;;  %v557_v33 = vld [vmem:[#allocation11 + $0x40] sm:$0xff]  ;;  %v556_v35 = vld [vmem:[#allocation11 + $0x38] sm:$0xff]  ;;  %s1212_s1 = sshll.u32 %s1312_s11, 4  ;;  %s1213_s1 = int_to_ptr.vmem [resolvable:$false] %s1212_s1 }
  0x69   : > { %993 = vmatprep.mubr.msk.f32.mxu0 %vm1309_vm0, %v1308_v0  ;;  %962 = vmatpush3.msra.mxu0 %v548_v21  ;;  %v541_v34 = vld [vmem:[#allocation10 + $0x40] sm:$0xff]  ;;  %v540_v36 = vld [vmem:[#allocation10 + $0x38] sm:$0xff]  ;;  %v555_v37 = vld [vmem:[#allocation11 + $0x30] sm:$0xff]  ;;  %p1210_p3 = pnand %p1209_p4, %p1434_p9  ;;  %s1214_s21 = scalar_lea.vmem %s1213_s1, 256 }
  0x6a   : > { %v413_v8 = vld [vmem:[#allocation2] sm:$0xff]  ;;  %963 = vmatprep.subr.mxu0 %v1308_v0  ;;  %v554_v39 = vld [vmem:[#allocation11 + $0x28] sm:$0xff]  ;;  %v553_v41 = vld [vmem:[#allocation11 + $0x20] sm:$0xff]  ;;  %p1215_p13 = scmp.lt.s32.totalorder %s731_s6, %s1213_s1  ;;  %p1216_p5 = scmp.lt.s32.totalorder %s1214_s21, %s1208_s10 }
  0x6b   : > { %964 = vmatpush3.msra.mxu0 %v547_v22  ;;  %v539_v38 = vld [vmem:[#allocation10 + $0x30] sm:$0xff]  ;;  %v538_v40 = vld [vmem:[#allocation10 + $0x28] sm:$0xff]  ;;  %v537_v42 = vld [vmem:[#allocation10 + $0x20] sm:$0xff]  ;;  %p1211_p7 = pneg %p1210_p3 }
  0x6c   : > { %965 = vmatprep.subr.mxu0 %v1308_v0  ;;  %v552_v43 = vld [vmem:[#allocation11 + $0x18] sm:$0xff]  ;;  %v551_v45 = vld [vmem:[#allocation11 + $0x10] sm:$0xff]  ;;  %v550_v47 = vld [vmem:[#allocation11 + $0x8] sm:$0xff]  ;;  %p1217_p10 = por %p1216_p5, %p1215_p13 }
  0x6d   : > { %966 = vmatpush3.msra.mxu0 %v546_v24  ;;  %v536_v44 = vld [vmem:[#allocation10 + $0x18] sm:$0xff]  ;;  %v535_v46 = vld [vmem:[#allocation10 + $0x10] sm:$0xff]  ;;  %v534_v48 = vld [vmem:[#allocation10 + $0x8] sm:$0xff] }
  0x6e   : > { %967 = vmatprep.subr.mxu0 %v1308_v0  ;;  %v549_v49 = vld [vmem:[#allocation11] sm:$0xff]  ;;  %v430_v50 = vld [vmem:[#allocation3] sm:$0xff]  ;;  %v873_v3 = vld [vmem:[%s1613_s4] ss:$0 sm:$0xff]  ;;  %p1218_p1 = pnand %p1217_p10, %p1211_p7 }
  0x6f   : > { %968 = vmatpush3.msra.mxu0 %v545_v26  ;;  %v533_v55 = vld [vmem:[#allocation10] sm:$0xff] }
  0x70   : > { %969 = vmatprep.subr.mxu0 %v1308_v0 }
  0x71   : > { %970 = vmatpush3.msra.mxu0 %v544_v28 }
  0x72   : > { %971 = vmatprep.subr.mxu0 %v1308_v0 }
  0x73   : > { %972 = vmatpush3.msra.mxu0 %v543_v30 }
  0x74   : > { %973 = vmatprep.subr.mxu0 %v1308_v0 }
  0x75   : > { %974 = vmatpush3.msra.mxu0 %v542_v32 }
  0x76   : > { %975 = vmatprep.subr.mxu0 %v1308_v0 }
  0x77   : > { %976 = vmatpush3.msra.mxu0 %v541_v34 }
  0x78   : > { %977 = vmatprep.subr.mxu0 %v1308_v0 }
  0x79   : > { %978 = vmatpush3.msra.mxu0 %v540_v36 }
  0x7a   : > { %979 = vmatprep.subr.mxu0 %v1308_v0 }
  0x7b   : > { %980 = vmatpush3.msra.mxu0 %v539_v38 }
  0x7c   : > { %981 = vmatprep.subr.mxu0 %v1308_v0 }
  0x7d   : > { %982 = vmatpush3.msra.mxu0 %v538_v40 }
  0x7e   : > { %983 = vmatprep.subr.mxu0 %v1308_v0 }
  0x7f   : > { %984 = vmatpush3.msra.mxu0 %v537_v42 }
  0x80   : > { %985 = vmatprep.subr.mxu0 %v1308_v0 }
  0x81   : > { %986 = vmatpush3.msra.mxu0 %v536_v44 }
  0x82   : > { %987 = vmatprep.subr.mxu0 %v1308_v0 }
  0x83   : > { %988 = vmatpush3.msra.mxu0 %v535_v46 }
  0x84   : > { %989 = vmatprep.subr.mxu0 %v1308_v0 }
  0x85   : > { %990 = vmatpush3.msra.mxu0 %v534_v48 }
  0x86   : > { %991 = vmatprep.subr.mxu0 %v1308_v0 }
  0x87   : > { %992 = vmatpush3.msra.mxu0 %v533_v55 }
 0x128   : > { %v409_v4 = vpop.f32.mrf.mxu0 }
 0x129   : > { %v415_v5 = vsel %vm414_vm2, %v409_v4, -inf }
 0x12a   : > { %416 = vmax.xlane.f32.xlu0 %v415_v5  ;;  %v920_v6 = vpop.f32.mrf.mxu0 }
 0x1b3   : > { %v417_v9 = vpop.xlane.xlu0 %416 }
 0x1b4   : > { %v418_v10 = vmax.f32 %v413_v8, %v417_v9 }
 0x1b6   : > { %v419_v11 = vsub.f32 %v413_v8, %v418_v10  ;;  %520 = vst.msk [vmem:[#allocation2] sm:$0xff] %vm337_vm1, %v418_v10  ;;  %424 = vperm.xlu0 %1090, %v418_v10  }
 0x1b8   : > { %v420_v16 = vmul.f32 1.442695, %v419_v11 }
 0x231   : > { %v425_v12 = vpop.permute.xlu0 %424 }
 0x232   : > { %v427_v13 = vsub.f32 %v409_v4, %v425_v12 }
 0x234   : > { %v428_v14 = vmul.f32 1.442695, %v427_v13 }
 0x236   : > { %1092 = vpow2.f32 %v428_v14 }
 0x237   : > { %1094 = vpow2.f32 %v420_v16 }
 0x243   : > { %v1093_v15 = vpop.eup %1092 }
 0x244   : > { %924 = vmatmul.mubr.msk.f32.vlgmr.msra.gmra.mxu1 %vm414_vm2, %v1093_v15  ;;  %v432_v17 = vsel %vm414_vm2, %v1093_v15, 0.0  ;;  %v1523_v18 = vpop.eup %1094 }
 0x245   : > { %433 = vadd.xlane.f32.xlu1 %v432_v17  ;;  %958 = vmatprep.mubr.msk.f32.mxu1 %vm1309_vm0, %v1308_v0  ;;  %v431_v51 = vmul.f32 %v1523_v18, %v430_v50 }
 0x246   : > { %927 = vmatpush3.msra.mxu1 %v564_v19 }
 0x247   : > { %928 = vmatprep.subr.mxu1 %v1308_v0 }
 0x248   : > { %929 = vmatpush3.msra.mxu1 %v563_v20 }
 0x249   : > { %930 = vmatprep.subr.mxu1 %v1308_v0 }
 0x24a   : > { %931 = vmatpush3.msra.mxu1 %v562_v23 }
 0x24b   : > { %932 = vmatprep.subr.mxu1 %v1308_v0 }
 0x24c   : > { %933 = vmatpush3.msra.mxu1 %v561_v25 }
 0x24d   : > { %934 = vmatprep.subr.mxu1 %v1308_v0 }
 0x24e   : > { %935 = vmatpush3.msra.mxu1 %v560_v27 }
 0x24f   : > { %936 = vmatprep.subr.mxu1 %v1308_v0 }
 0x250   : > { %937 = vmatpush3.msra.mxu1 %v559_v29 }
 0x251   : > { %938 = vmatprep.subr.mxu1 %v1308_v0 }
 0x252   : > { %939 = vmatpush3.msra.mxu1 %v558_v31 }
 0x253   : > { %940 = vmatprep.subr.mxu1 %v1308_v0 }
 0x254   : > { %941 = vmatpush3.msra.mxu1 %v557_v33 }
 0x255   : > { %942 = vmatprep.subr.mxu1 %v1308_v0 }
 0x256   : > { %441 = vperm.xlu1 %1091, %v1523_v18   ;;  %943 = vmatpush3.msra.mxu1 %v556_v35 }
 0x257   : > { %944 = vmatprep.subr.mxu1 %v1308_v0 }
 0x258   : > { %945 = vmatpush3.msra.mxu1 %v555_v37 }
 0x259   : > { %946 = vmatprep.subr.mxu1 %v1308_v0 }
 0x25a   : > { %947 = vmatpush3.msra.mxu1 %v554_v39 }
 0x25b   : > { %948 = vmatprep.subr.mxu1 %v1308_v0 }
 0x25c   : > { %949 = vmatpush3.msra.mxu1 %v553_v41 }
 0x25d   : > { %950 = vmatprep.subr.mxu1 %v1308_v0 }
 0x25e   : > { %951 = vmatpush3.msra.mxu1 %v552_v43 }
 0x25f   : > { %952 = vmatprep.subr.mxu1 %v1308_v0 }
 0x260   : > { %953 = vmatpush3.msra.mxu1 %v551_v45 }
 0x261   : > { %954 = vmatprep.subr.mxu1 %v1308_v0 }
 0x262   : > { %955 = vmatpush3.msra.mxu1 %v550_v47 }
 0x263   : > { %956 = vmatprep.subr.mxu1 %v1308_v0 }
 0x264   : > { %957 = vmatpush3.msra.mxu1 %v549_v49 }
 0x265   : > { %959 = vmatmul.mubr.f32.vlgmr.msra.gmra.mxu1 %v1507_v2 }
 0x2ce   : > { %v434_v52 = vpop.xlane.xlu1 %433 }
 0x2cf   : > { %v435_v53 = vadd.f32 %v434_v52, %v431_v51 }
 0x2d1   : > { %437 = vst.msk [vmem:[#allocation3] sm:$0xff] %vm337_vm1, %v435_v53 }
 0x2d2   : > { %v442_v59 = vpop.permute.xlu1 %441 }
 0x2d3   : > { %v444_v60 = vmul.f32 0.0, %v442_v59 }
 0x2d8   : > { %v524_v54 = vld [vmem:[#allocation3] sm:$0xff] }
 0x2d9   : > { %1096 = vrcp.f32 %v524_v54 }
 0x2e6   : > { %v1097_v56 = vpop.eup %1096 }
 0x2e7   : > { %529 = vperm.xlu1 %1091, %v1097_v56  }
 0x304   : > { %v514_v57 = vpop.f32.mrf.mxu1 }
 0x305   : > { %v518_v61 = vadd.f32 %v514_v57, %v444_v60 }
 0x306   : > { %v925_v58 = vpop.f32.mrf.mxu1 }
 0x325   : > { %v631_v0 = vpop.f32.mrf.mxu1 }
 0x327   : > { %v960_v1 = vpop.f32.mrf.mxu1 }
 0x362   : > { %v530_v62 = vpop.permute.xlu1 %529 }
 0x363   : > { %v532_v63 = vmul.f32 %v530_v62, %v518_v61 }
 0x365   : > { %994 = vmatmul.mubr.f32.vlgmr.msra.gmra.mxu0 %v532_v63 }
 0x425   : > { %v701_v2 = vpop.f32.mrf.mxu0 }
 0x426   : > { %v702_v4 = vadd.f32 %v701_v2, %v631_v0 }
 0x427   : > { %v995_v5 = vpop.f32.mrf.mxu0 }
 0x428   : > { %v712_v6 = vadd.f32 %v873_v3, %v702_v4 }
 0x42a   : > { %1098 = vtanh.f32 %v712_v6 }
 0x437   : > { %v1099_v7 = vpop.eup %1098 }
 0x438   : > { %714 = vst [vmem:[%s332_s13] sm:$0xff] %v1099_v7 }
 0x439   : > { %1221 = shalt.err (!%p1218_p1)
}
 0x43a   : > { %s1222_s12 = scalar_lea.hbm %s1567_s30, 128  ;;  %s1226_s2 = scalar_lea.hbm %s1614_s5, 256 }
 0x43b   : > { %p1223_p2 = scmp.ne.s32.totalorder %s1567_s30, %s1222_s12  ;;  %p1227_p11 = scmp.lt.s32.totalorder %s1567_s30, %s1614_s5 }
 0x43c   : > { %p1228_p0 = scmp.lt.s32.totalorder %s1226_s2, %s1222_s12 }
 0x43d   : > { %p1224_p6 = pnand %p1223_p2, %p1434_p9 }
 0x43e   : > { %p1229_p12 = por %p1228_p0, %p1227_p11 }
 0x43f   : > { %p1225_p8 = pneg %p1224_p6 }
 0x441   : > { %p1230_p4 = pnand %p1229_p12, %p1225_p8 }
 0x443   : > { %1233 = shalt.err (!%p1230_p4)
}
 0x444   : > { %1008 = dma.vmem_to_hbm [thread:$0]  (%p1434_p9), %s731_s6, 128, %s1567_s30, %s716_s0  }
 0x445 PF: > { %s742_s24 = sand.u32 1, %s1280_s18   ;;  %p1633_p3 = scmp.ne.s32.totalorder %s1620_s27, 0 }
 0x446   : > { %p1634_p7 = scmp.ge.s32.totalorder %s1300_s23, 2  ;;  %s743_s26 = scalar_lea.sflag [#allocation7], %s742_s24 }
 0x448   : > { %p1025_p13 = pnand %p1634_p7, %p1633_p3 }
 0x44a   : > { %p1026_p5 = pneg %p1025_p13 }
 0x44c   : > { %1275 = dma.done.wait (%p1026_p5), %s743_s26, 128  }
 0x44d   : > { %1277 = vsyncadd (%p1026_p5), %s743_s26, 4294967168  ;;  %s25_s23 = sadd.s32 1, %s1300_s23   ;;  %s1635_s18 = smov %s1284_s19 }
 0x44e   : > { %p22_p10 = scmp.ge.s32.totalorder %s25_s23, 4   ;;  %s1636_s19 = smov %s1288_s20 }
 0x44f   : > { %s1637_s20 = smov %s1443_s9  ;;  %s1638_s21 = smov %s1296_s22 }
 0x450   : > { %s1639_s22 = smov %s1641_s17  ;;  %24 = sbr.rel (!%p22_p10) target bundleno = 13 (0xd), region = 114 }
 0x455   :  { %748 = vsyncpa [#allocation6], 1 }
 0x456   :  { %750 = vsyncpa [#allocation6 + $0x1], 1 }
 0x457   :  { %751 = vsyncpa [#allocation9], 1 }
 0x458   :  { %753 = vsyncpa [#allocation9 + $0x1], 1 }
 0x459   :  { %754 = vsyncpa [#allocation12], 1 }
 0x45a   :  { %755 = vsyncpa [#allocation7], 1 }
 0x45b   :  { %757 = vsyncpa [#allocation7 + $0x1], 1 }

</bundles_post_ra>
